<compile_context>
chip_gen: v7x
topology: tpu7x:2x2x1
jax: 0.10.0
libtpu: 0.0.40
codegen_flags: <defaults>
</compile_context>

<pallas_src>
import functools

import jax
import jax.numpy as jnp
from jax.experimental import pallas as pl
from jax.experimental.pallas import tpu as pltpu


# ---------------------------------------------------------------------------
# Kernel
# ---------------------------------------------------------------------------

def _outconv_kernel(x_ref, w_ref, b_ref, o_ref):
    """Channel mix over a lane-dense spatial tile, for a small batch block.

    x_ref: (nb, Cin,  tS) VMEM
    w_ref: (Cout, Cin)    VMEM
    b_ref: (Cout, 1)      VMEM
    o_ref: (nb, Cout, tS) VMEM
    """
    w = w_ref[...]
    b = b_ref[...].astype(jnp.float32)
    nb = x_ref.shape[0]
    for i in range(nb):  # nb is static & small -> fully unrolled
        acc = jnp.dot(w, x_ref[i], preferred_element_type=jnp.float32)
        o_ref[i] = (acc + b).astype(o_ref.dtype)  # one lane-dense block store


# ---------------------------------------------------------------------------
# Wrapper
# ---------------------------------------------------------------------------

def _round_down(x, m):
    return (x // m) * m


def _largest_divisor_leq(n, cap):
    cap = max(1, min(int(n), int(cap)))
    for d in range(cap, 0, -1):
        if n % d == 0:
            return d
    return 1


def _vmem_capacity_bytes():
    try:
        return int(pltpu.get_tpu_info().vmem_capacity_bytes)
    except Exception:
        return 64 * 1024 * 1024  # conservative fallback (v7x physical)


@functools.partial(jax.jit, static_argnames=("max_lanes",))
def outconv_forward(x, weight, bias, *, max_lanes=None):
    """1x1 Conv2d forward (== nn.Conv2d(Cin, Cout, kernel_size=1)).

    x:      [B, Cin, H, W]   (NCHW, like PyTorch)
    weight: [Cout, Cin, 1, 1]
    bias:   [Cout]
    returns [B, Cout, H, W]

    `max_lanes` (static, testing only) caps the per-step spatial lanes so a
    ragged last spatial block can be exercised at small shapes.
    """
    B, Cin, H, W = x.shape
    Cout = weight.shape[0]
    S = H * W

    x3 = x.reshape(B, Cin, S)          # free reshape (NCHW contiguous)
    w2 = weight.reshape(Cout, Cin)
    b2 = bias.reshape(Cout, 1)

    itemsize = jnp.dtype(x.dtype).itemsize
    vmem_cap = _vmem_capacity_bytes()
    # Leave at least half the physical VMEM as headroom; never budget >48 MiB.
    budget = min(vmem_cap // 2, 48 * 1024 * 1024)

    # Total lanes (spatial elems across the batch block) per grid step such
    # that double-buffered input + output blocks fit the budget.
    lanes = budget // max(1, 2 * (Cin + Cout) * itemsize)
    lanes = max(128, min(64 * 1024, _round_down(lanes, 128)))
    if max_lanes is not None:
        lanes = max(128, _round_down(min(lanes, max_lanes), 128))

    if S > lanes:
        # Tile the spatial axis; ragged last block is masked on writeback.
        nb = 1
        tS = lanes
        grid_s = pl.cdiv(S, tS)
    else:
        # Full spatial extent per step; block several batch images together.
        tS = S
        grid_s = 1
        nb = _largest_divisor_leq(B, max(1, lanes // max(S, 1)))
        if nb == B and B >= 2:
            # Keep >= 2 grid steps so both v7x TensorCores get work.
            nb = _largest_divisor_leq(B, B // 2)
        if B == 1 and S >= 256:
            # Single image, single tile: split the spatial axis across cores.
            tS = max(128, _round_down(pl.cdiv(S, 2), 128))
            grid_s = pl.cdiv(S, tS)
    grid_b = pl.cdiv(B, nb)
    grid = (grid_b, grid_s)

    # Per-step VMEM footprint (double-buffered x/out blocks + weights/bias).
    footprint = 2 * nb * (Cin + Cout) * tS * itemsize
    footprint += 2 * (Cout * Cin + Cout) * jnp.dtype(weight.dtype).itemsize
    vmem_limit = int(min(max(32 * 1024 * 1024, footprint + (8 << 20)),
                         max(vmem_cap - (8 << 20), 16 << 20)))

    out3 = pl.pallas_call(
        _outconv_kernel,
        out_shape=jax.ShapeDtypeStruct((B, Cout, S), x.dtype),
        grid=grid,
        in_specs=[
            pl.BlockSpec((nb, Cin, tS), lambda b, s: (b, 0, s)),
            pl.BlockSpec((Cout, Cin), lambda b, s: (0, 0)),
            pl.BlockSpec((Cout, 1), lambda b, s: (0, 0)),
        ],
        out_specs=pl.BlockSpec((nb, Cout, tS), lambda b, s: (b, 0, s)),
        compiler_params=pltpu.CompilerParams(
            dimension_semantics=("parallel", "parallel"),
            vmem_limit_bytes=vmem_limit),
    )(x3, w2, b2)

    return out3.reshape(B, Cout, H, W)  # free reshape back to NCHW


# ---------------------------------------------------------------------------
# Demo / correctness check
# ---------------------------------------------------------------------------

def _torch_style_init(key, cin, cout):
    kw, kb = jax.random.split(key)
    bound = 1.0 / (cin ** 0.5)
    w = jax.random.uniform(kw, (cout, cin, 1, 1), jnp.float32,
                           minval=-bound, maxval=bound)
    b = jax.random.uniform(kb, (cout,), jnp.float32,
                           minval=-bound, maxval=bound)
    return w, b


def _reference(x, weight, bias):
    cout, cin = weight.shape[0], weight.shape[1]
    return (jnp.einsum("bchw,oc->bohw", x, weight.reshape(cout, cin),
                       precision=jax.lax.Precision.HIGHEST)
            + bias.reshape(1, cout, 1, 1))


if __name__ == "__main__":
    key = jax.random.PRNGKey(0)
    k1, k2, k3, k4, k5, k6 = jax.random.split(key, 6)

    # --- UNet-OutConv-sized case (tiny channels) -----------------------------
    B, Cin, H, W, Cout = 2, 4, 16, 16, 3
    x = jax.random.normal(k1, (B, Cin, H, W), dtype=jnp.float32)
    weight, bias = _torch_style_init(k2, Cin, Cout)

    out = jax.block_until_ready(outconv_forward(x, weight, bias))
    ref = _reference(x, weight, bias)
    assert out.shape == (B, Cout, H, W), out.shape
    assert jnp.allclose(out, ref, atol=1e-5, rtol=1e-5), \
        float(jnp.max(jnp.abs(out - ref)))

    # --- Larger channel counts ------------------------------------------------
    B2, Cin2, H2, W2, Cout2 = 1, 32, 8, 8, 16
    x2 = jax.random.normal(k3, (B2, Cin2, H2, W2), dtype=jnp.float32)
    weight2, bias2 = _torch_style_init(k4, Cin2, Cout2)

    out2 = jax.block_until_ready(outconv_forward(x2, weight2, bias2))
    ref2 = _reference(x2, weight2, bias2)
    assert out2.shape == (B2, Cout2, H2, W2), out2.shape
    assert jnp.allclose(out2, ref2, atol=1e-4, rtol=1e-4), \
        float(jnp.max(jnp.abs(out2 - ref2)))

    # --- Ragged last spatial block (S % tS != 0), forced small tile ----------
    B3, Cin3, H3, W3, Cout3 = 2, 4, 18, 18, 3     # S = 324, tS forced to 128
    x3 = jax.random.normal(k5, (B3, Cin3, H3, W3), dtype=jnp.float32)
    weight3, bias3 = _torch_style_init(k6, Cin3, Cout3)

    out3 = jax.block_until_ready(
        outconv_forward(x3, weight3, bias3, max_lanes=128))
    ref3 = _reference(x3, weight3, bias3)
    assert out3.shape == (B3, Cout3, H3, W3), out3.shape
    assert jnp.allclose(out3, ref3, atol=1e-5, rtol=1e-5), \
        float(jnp.max(jnp.abs(out3 - ref3)))

    print("KERNEL_OK")
</pallas_src>

<mosaic_0001>
module attributes {stable_mosaic.version = 11 : i64} {
  func.func @_outconv_kernel(%arg0: i32, %arg1: i32, %arg2: memref<1x4x256xf32, #tpu.memory_space<vmem>>, %arg3: memref<3x4xf32, #tpu.memory_space<vmem>>, %arg4: memref<3x1xf32, #tpu.memory_space<vmem>>, %arg5: memref<1x3x256xf32, #tpu.memory_space<vmem>>) attributes {dimension_semantics = [#tpu.dimension_semantics<parallel>, #tpu.dimension_semantics<parallel>], iteration_bounds = array<i64: 2, 1>, scalar_prefetch = 0 : i64, scratch_operands = 0 : i64, tpu.core_type = #tpu.core_type<tc>, window_params = [{transform_indices = @transform_0, window_bounds = array<i64: 1, 4, 256>}, {pipeline_mode = #tpu.pipeline_mode<synchronous>, transform_indices = @transform_1, window_bounds = array<i64: 3, 4>}, {pipeline_mode = #tpu.pipeline_mode<synchronous>, transform_indices = @transform_2, window_bounds = array<i64: 3, 1>}, {transform_indices = @transform_3, window_bounds = array<i64: 1, 3, 256>}]} {
    %c0 = arith.constant 0 : index
    %c0_0 = arith.constant 0 : index
    %0 = vector.load %arg3[%c0, %c0_0] : memref<3x4xf32, #tpu.memory_space<vmem>>, vector<3x4xf32>
    %c0_1 = arith.constant 0 : index
    %c0_2 = arith.constant 0 : index
    %1 = vector.load %arg4[%c0_1, %c0_2] : memref<3x1xf32, #tpu.memory_space<vmem>>, vector<3x1xf32>
    %c0_3 = arith.constant 0 : index
    %c0_4 = arith.constant 0 : index
    %c0_5 = arith.constant 0 : index
    %2 = vector.load %arg2[%c0_3, %c0_4, %c0_5] : memref<1x4x256xf32, #tpu.memory_space<vmem>>, vector<1x4x256xf32>
    %3 = vector.shape_cast %2 : vector<1x4x256xf32> to vector<4x256xf32>
    %cst = arith.constant dense<0.000000e+00> : vector<3x256xf32>
    %4 = tpu.matmul %0, %3, %cst {dimension_numbers = #tpu.dot_dimension_numbers<[1], [0], [0], [1], [0, 0, 1, 1], [], []>} : vector<3x4xf32>, vector<4x256xf32>, vector<3x256xf32> -> vector<3x256xf32>
    %5 = vector.broadcast %1 : vector<3x1xf32> to vector<3x256xf32>
    %6 = arith.addf %4, %5 : vector<3x256xf32>
    %c0_6 = arith.constant 0 : index
    %c0_7 = arith.constant 0 : index
    %c0_8 = arith.constant 0 : index
    %7 = vector.load %arg5[%c0_6, %c0_7, %c0_8] : memref<1x3x256xf32, #tpu.memory_space<vmem>>, vector<1x3x256xf32>
    %8 = vector.shape_cast %7 : vector<1x3x256xf32> to vector<3x256xf32>
    %9 = vector.shape_cast %6 : vector<3x256xf32> to vector<1x3x256xf32>
    tpu.vector_store %arg5[%c0_6, %c0_7, %c0_8], %9 {strides = array<i32>} : memref<1x3x256xf32, #tpu.memory_space<vmem>>, vector<1x3x256xf32>,
    return
  }
  func.func @transform_0(%arg0: i32, %arg1: i32) -> (i32, i32, i32) {
    %c0_i32 = arith.constant 0 : i32
    %c0_i32_0 = arith.constant 0 : i32
    return %arg0, %c0_i32, %arg1 : i32, i32, i32
  }
  func.func @transform_1(%arg0: i32, %arg1: i32) -> (i32, i32) {
    %c0_i32 = arith.constant 0 : i32
    %c0_i32_0 = arith.constant 0 : i32
    %c0_i32_1 = arith.constant 0 : i32
    return %c0_i32, %c0_i32_0 : i32, i32
  }
  func.func @transform_2(%arg0: i32, %arg1: i32) -> (i32, i32) {
    %c0_i32 = arith.constant 0 : i32
    %c0_i32_0 = arith.constant 0 : i32
    %c0_i32_1 = arith.constant 0 : i32
    return %c0_i32, %c0_i32_0 : i32, i32
  }
  func.func @transform_3(%arg0: i32, %arg1: i32) -> (i32, i32, i32) {
    %c0_i32 = arith.constant 0 : i32
    %c0_i32_0 = arith.constant 0 : i32
    return %arg0, %c0_i32, %arg1 : i32, i32, i32
  }
}

</mosaic_0001>

<bundles_post_ra>
// kernel: outconv_forward.1
= control target key start
LH: loop header
LB: loop body
LE: loop exit
PB: predicated region body
PF: predicated region fallthrough
CT: control target
= control target key end

     0   :  { %s482_s12 = smov 0   ;;  %s484_s13 = smov 0   ;;  %s521_s0 = inlined_call_operand.vmem [shape: f32[2,4,256], index: 0, kind: input, shape index: {}]   ;;  %s522_s1 = inlined_call_operand.vmem [shape: f32[3,4], index: 1, kind: input, shape index: {}]   ;;  %s523_s2 = inlined_call_operand.vmem [shape: f32[3,1], index: 2, kind: input, shape index: {}]   ;;  %s524_s3 = inlined_call_operand.vmem [shape: f32[2,3,256], index: 3, kind: output, shape index: {}]  }
   0x1   :  { %s486_s14 = smov 0  }
   0x2 LB: > { %s25_s15 = sadd.s32 1, %s454_s13  ;;  %p396_p0 = scmp.ge.s32.totalorder %s458_s14, 1  ;;  %s458_s14 = sphi %s486_s14, %s13_s14   ;;  %s454_s13 = sphi %s484_s13, %s526_s13   ;;  %s450_s12 = sphi %s482_s12, %s525_s12  }
   0x3   : > { %p27_p1 = scmp.ge.s32.totalorder %s25_s15, 2  ;;  %p158_p2 = scmp.lt.s32.totalorder %s458_s14, 3 }
   0x5   : > { %s528_s15 = smov (%p27_p1, %s25_s15), 0  ;;  %p159_p3 = pnand %p396_p0, %p158_p2 }
   0x6   : > { %p191_p4 = scmp.lt.s32.totalorder (!%p159_p3), %s450_s12, 1  ;;  %v460_v0 = vmov (!%p159_p3), 0.0   ;;  %v211_v1 = vld [vmem:[%s523_s2] sm:$0x7] (!%p159_p3)  ;;  %v461_v2 = vmov (!%p159_p3), 0   ;;  %vm224_vm0 = vcmask (!%p159_p3), 1043456  }
   0x7   : > { %162 = sbr.rel (%p159_p3) target bundleno = 240 (0xf0), region = 32  ;;  %293 = vmatprep.mubr.f32.mxu0 (!%p159_p3), %v460_v0  ;;  %434 = vset.pattern.permute.xlu0 (!%p159_p3), %v461_v2  ;;  %v210_v5 = vld [vmem:[%s522_s1] sm:$0x7] (!%p159_p3)  ;;  %vm220_vm1 = vcmask (!%p159_p3), 31744  }
   0x8   : > { %215 = vperm.xlu0 (!%p159_p3), %434, %v211_v1  }
   0xe   : > { %s530_s12 = smov (!%p191_p4, %s450_s12), 1 }
   0xf   : > { %s406_s18 = sshll.u32 %s530_s12, 3 }
  0x10   : > { %s198_s21 = scalar_lea.vmem %s521_s0, %s406_s18  ;;  %s208_s26 = scalar_lea.vmem %s524_s3, %s406_s18 }
  0x11   : > { %v212_v3 = vld [vmem:[%s198_s21] sm:$0xff] }
  0x12   : > { %v219_v4 = vcombine.high %v212_v3, %v212_v3 }
  0x14   : > { %401 = vmatprep.subr.msk.mxu0 %vm224_vm0, %v219_v4 }
  0x15   : > { %402 = vmatpush1.msk.msra.mxu0 %vm224_vm0, %v212_v3 }
  0x16   : > { %403 = vmatmul.mubr.msk.f32.vlgmr.msra.gmra.mrb[0].mxu0 %vm220_vm1, %v210_v5 }
  0x87   : > { %v216_v6 = vpop.permute.xlu0 %215 }
  0xe9   : > { %v295_v7 = vpop.f32.mrb[0].mxu0 }
  0xea   : > { %v296_v8 = vadd.f32 %v295_v7, %v216_v6  ;;  %v297_v9 = vpop.f32.mrb[1].mxu0 }
  0xeb   : > { %v298_v10 = vadd.f32 %v297_v9, %v216_v6 }
  0xed   : > { %v302_v11 = vcombine.low %v296_v8, %v298_v10 }
  0xef   : > { %304 = vst [vmem:[%s208_s26] sm:$0x77] %v302_v11 }
  0xf0 PF: > { %s13_s14 = sadd.s32 1, %s458_s14   ;;  %s525_s12 = smov %s454_s13 }
  0xf1   : > { %p10_p5 = scmp.ge.s32.totalorder %s13_s14, 4   ;;  %s526_s13 = smov %s528_s15 }
  0xf3   :  { %12 = sbr.rel (!%p10_p5) target bundleno = 2 (0x2), region = 62 }

</bundles_post_ra>
